<compile_context>
chip_gen: v7x
topology: tpu7x:2x2x1
jax: 0.10.0
libtpu: 0.0.40
codegen_flags: <defaults>
</compile_context>

<pallas_src>
import jax
import jax.numpy as jnp
from jax.experimental import pallas as pl
from jax.experimental.pallas import tpu as pltpu


def _dice_partial_kernel(x_ref, t_ref, pt_ref, st_ref):
    # x_ref/t_ref: (rb, 128) tiles.  pt_ref/st_ref: (8, 128) per-block partials.
    x = x_ref[...].astype(jnp.float32)
    t = t_ref[...].astype(jnp.float32)
    rb, lane = x_ref.shape
    # Fold (rb,128) -> (8,128) with VALU adds only (no cross-lane XLU work;
    # the reshape splits the leading dim so no relayout is needed).
    pt_ref[...] = jnp.sum((x * t).reshape(rb // 8, 8, lane), axis=0)
    st_ref[...] = jnp.sum((x + t).reshape(rb // 8, 8, lane), axis=0)


def soft_dice_loss(prediction, target, *, rows_per_block=1024):
    """Soft dice loss over arbitrarily-shaped prediction/target tensors."""
    assert prediction.size == target.size
    lane = 128
    n_total = int(prediction.size)

    x = prediction.reshape(-1)
    t = target.reshape(-1)

    rows = -(-n_total // lane)                       # ceil(n_total / 128)
    # Large tile (amortizes per-step overhead); multiple of 32 sublanes so the
    # block is legal for f32/bf16/int8 inputs alike.  Never inflate to the
    # full slab — pad instead (zeros contribute 0 to all sums).
    rb = min(rows_per_block, rows)
    rb = -(-rb // 32) * 32
    padded_rows = -(-rows // rb) * rb
    pad = padded_rows * lane - n_total
    if pad:
        x = jnp.pad(x, (0, pad))
        t = jnp.pad(t, (0, pad))
    x2 = x.reshape(padded_rows, lane)
    t2 = t.reshape(padded_rows, lane)
    nblocks = padded_rows // rb

    pt_partials, st_partials = pl.pallas_call(
        _dice_partial_kernel,
        out_shape=(
            jax.ShapeDtypeStruct((nblocks, 8, lane), jnp.float32),
            jax.ShapeDtypeStruct((nblocks, 8, lane), jnp.float32),
        ),
        grid_spec=pltpu.PrefetchScalarGridSpec(
            num_scalar_prefetch=0,
            grid=(nblocks,),
            in_specs=[
                pl.BlockSpec((rb, lane), lambda i: (i, 0)),
                pl.BlockSpec((rb, lane), lambda i: (i, 0)),
            ],
            out_specs=[
                pl.BlockSpec((None, 8, lane), lambda i: (i, 0, 0)),
                pl.BlockSpec((None, 8, lane), lambda i: (i, 0, 0)),
            ],
        ),
        compiler_params=pltpu.CompilerParams(
            # Independent per-block partials -> fully parallel grid (both
            # TensorCores on v7x; harmless elsewhere).
            dimension_semantics=("parallel",),
            vmem_limit_bytes=32 * 1024 * 1024,
        ),
    )(x2, t2)

    # Tiny final combine (nblocks * 8 * 128 partials) done in plain JAX.
    smooth = jnp.float32(1.0)
    intersection = jnp.sum(pt_partials)
    total = jnp.sum(st_partials)  # sum(pred) + sum(target)
    return 1.0 - (2.0 * intersection + smooth) / (total + smooth)


def _reference_loss(prediction, target):
    p = prediction.astype(jnp.float32).reshape(-1)
    t = target.astype(jnp.float32).reshape(-1)
    smooth = 1.0
    inter = jnp.sum(p * t)
    return 1.0 - (2.0 * inter + smooth) / (jnp.sum(p) + jnp.sum(t) + smooth)


if __name__ == "__main__":
    key = jax.random.PRNGKey(0)
    k1, k2, k3, k4, k5, k6 = jax.random.split(key, 6)

    # Primary small NCHW example (probabilities vs. binary masks).
    pred = jax.random.uniform(k1, (2, 4, 16, 16), dtype=jnp.float32)
    targ = (jax.random.uniform(k2, (2, 4, 16, 16)) > 0.5).astype(jnp.float32)
    loss = soft_dice_loss(pred, targ)
    jax.block_until_ready(loss)
    ref = _reference_loss(pred, targ)
    assert jnp.allclose(loss, ref, rtol=1e-5, atol=1e-5), (loss, ref)

    # Non-128-divisible total size -> exercises the zero-padding path.
    pred2 = jax.random.uniform(k3, (3, 5, 7, 11), dtype=jnp.float32)
    targ2 = (jax.random.uniform(k4, (3, 5, 7, 11)) > 0.5).astype(jnp.float32)
    loss2 = soft_dice_loss(pred2, targ2)
    jax.block_until_ready(loss2)
    ref2 = _reference_loss(pred2, targ2)
    assert jnp.allclose(loss2, ref2, rtol=1e-5, atol=1e-5), (loss2, ref2)

    # Multi-block (parallel grid) path with a smaller forced tile.
    pred3 = jax.random.uniform(k5, (2, 4, 64, 64), dtype=jnp.float32)
    targ3 = (jax.random.uniform(k6, (2, 4, 64, 64)) > 0.5).astype(jnp.float32)
    loss3 = soft_dice_loss(pred3, targ3, rows_per_block=32)
    jax.block_until_ready(loss3)
    ref3 = _reference_loss(pred3, targ3)
    assert jnp.allclose(loss3, ref3, rtol=1e-5, atol=1e-5), (loss3, ref3)

    print("KERNEL_OK")
</pallas_src>

<mosaic_0001>
module attributes {stable_mosaic.version = 11 : i64} {
  func.func @_dice_partial_kernel(%arg0: i32, %arg1: memref<32x128xf32, #tpu.memory_space<vmem>>, %arg2: memref<32x128xf32, #tpu.memory_space<vmem>>, %arg3: memref<1x8x128xf32, #tpu.memory_space<vmem>>, %arg4: memref<1x8x128xf32, #tpu.memory_space<vmem>>) attributes {dimension_semantics = [#tpu.dimension_semantics<parallel>], iteration_bounds = array<i64: 1>, scalar_prefetch = 0 : i64, scratch_operands = 0 : i64, tpu.core_type = #tpu.core_type<tc>, window_params = [{transform_indices = @transform_0, window_bounds = array<i64: 32, 128>}, {transform_indices = @transform_1, window_bounds = array<i64: 32, 128>}, {transform_indices = @transform_2, window_bounds = array<i64: 1, 8, 128>}, {transform_indices = @transform_3, window_bounds = array<i64: 1, 8, 128>}]} {
    %c0 = arith.constant 0 : index
    %c0_0 = arith.constant 0 : index
    %0 = vector.load %arg1[%c0, %c0_0] : memref<32x128xf32, #tpu.memory_space<vmem>>, vector<32x128xf32>
    %c0_1 = arith.constant 0 : index
    %c0_2 = arith.constant 0 : index
    %1 = vector.load %arg2[%c0_1, %c0_2] : memref<32x128xf32, #tpu.memory_space<vmem>>, vector<32x128xf32>
    %2 = arith.mulf %0, %1 : vector<32x128xf32>
    %3 = vector.shape_cast %2 : vector<32x128xf32> to vector<4x8x128xf32>
    %cst = arith.constant dense<0.000000e+00> : vector<8x128xf32>
    %4 = vector.multi_reduction <add>, %3, %cst [0] : vector<4x8x128xf32> to vector<8x128xf32>
    %c0_3 = arith.constant 0 : index
    %c0_4 = arith.constant 0 : index
    %c0_5 = arith.constant 0 : index
    %5 = vector.load %arg3[%c0_3, %c0_4, %c0_5] : memref<1x8x128xf32, #tpu.memory_space<vmem>>, vector<1x8x128xf32>
    %6 = vector.shape_cast %5 : vector<1x8x128xf32> to vector<8x128xf32>
    %7 = vector.shape_cast %4 : vector<8x128xf32> to vector<1x8x128xf32>
    tpu.vector_store %arg3[%c0_3, %c0_4, %c0_5], %7 {strides = array<i32>} : memref<1x8x128xf32, #tpu.memory_space<vmem>>, vector<1x8x128xf32>,
    %8 = arith.addf %0, %1 : vector<32x128xf32>
    %9 = vector.shape_cast %8 : vector<32x128xf32> to vector<4x8x128xf32>
    %cst_6 = arith.constant dense<0.000000e+00> : vector<8x128xf32>
    %10 = vector.multi_reduction <add>, %9, %cst_6 [0] : vector<4x8x128xf32> to vector<8x128xf32>
    %c0_7 = arith.constant 0 : index
    %c0_8 = arith.constant 0 : index
    %c0_9 = arith.constant 0 : index
    %11 = vector.load %arg4[%c0_7, %c0_8, %c0_9] : memref<1x8x128xf32, #tpu.memory_space<vmem>>, vector<1x8x128xf32>
    %12 = vector.shape_cast %11 : vector<1x8x128xf32> to vector<8x128xf32>
    %13 = vector.shape_cast %10 : vector<8x128xf32> to vector<1x8x128xf32>
    tpu.vector_store %arg4[%c0_7, %c0_8, %c0_9], %13 {strides = array<i32>} : memref<1x8x128xf32, #tpu.memory_space<vmem>>, vector<1x8x128xf32>,
    return
  }
  func.func @transform_0(%arg0: i32) -> (i32, i32) {
    %c0_i32 = arith.constant 0 : i32
    %c0_i32_0 = arith.constant 0 : i32
    return %arg0, %c0_i32 : i32, i32
  }
  func.func @transform_1(%arg0: i32) -> (i32, i32) {
    %c0_i32 = arith.constant 0 : i32
    %c0_i32_0 = arith.constant 0 : i32
    return %arg0, %c0_i32 : i32, i32
  }
  func.func @transform_2(%arg0: i32) -> (i32, i32, i32) {
    %c0_i32 = arith.constant 0 : i32
    %c0_i32_0 = arith.constant 0 : i32
    %c0_i32_1 = arith.constant 0 : i32
    return %arg0, %c0_i32, %c0_i32_0 : i32, i32, i32
  }
  func.func @transform_3(%arg0: i32) -> (i32, i32, i32) {
    %c0_i32 = arith.constant 0 : i32
    %c0_i32_0 = arith.constant 0 : i32
    %c0_i32_1 = arith.constant 0 : i32
    return %arg0, %c0_i32, %c0_i32_0 : i32, i32, i32
  }
}

</mosaic_0001>

<bundles_post_ra>
// kernel: tpu_custom_call.1
= control target key start
LH: loop header
LB: loop body
LE: loop exit
PB: predicated region body
PF: predicated region fallthrough
CT: control target
= control target key end

     0   :  { %9 = vsyncpa [#allocation3], 0  ;;  %s273_s0 = inlined_call_operand.hbm [shape: f32[32,128], index: 0, kind: input, shape index: {}]   ;;  %s274_s1 = inlined_call_operand.hbm [shape: f32[32,128], index: 1, kind: input, shape index: {}]   ;;  %s275_s2 = inlined_call_operand.hbm [shape: f32[1,8,128], index: 2, kind: output, shape index: {0}]   ;;  %s276_s3 = inlined_call_operand.hbm [shape: f32[1,8,128], index: 3, kind: output, shape index: {1}]  }
   0x1   :  { %10 = vsyncpa [#allocation6], 0 }
   0x2   :  { %11 = vsyncpa [#allocation4], 0 }
   0x3   :  { %12 = vsyncpa [#allocation9], 0  ;;  %s199_s12 = smov [#allocation2]   ;;  %s103_s16 = scalar_lea.hbm %s273_s0, 512 }
   0x4   :  { %s18_s13 = sshll.u32 %s199_s12, 4  ;;  %p104_p0 = scmp.ne.s32.totalorder %s273_s0, %s103_s16  ;;  %s19_s13 = int_to_ptr.vmem [resolvable:$true] %s18_s13 }
   0x5   :  { %p107_p1 = scmp.lt.u32.totalorder %s103_s16, %s273_s0 }
   0x7   :  { %p109_p2 = pnand %p107_p1, %p104_p0 }
   0x9   :  { %112 = shalt.err (!%p109_p2)
}
   0xa   :  { %s113_s21 = scalar_lea.vmem %s19_s13, 512  ;;  %p118_p4 = scmp.lt.s32.totalorder %s19_s13, %s19_s13 }
   0xb   :  { %p114_p3 = scmp.ne.s32.totalorder %s19_s13, %s113_s21  ;;  %p119_p5 = scmp.lt.s32.totalorder %s113_s21, %s113_s21 }
   0xd   :  { %p120_p6 = por %p119_p5, %p118_p4 }
   0xf   :  { %p121_p7 = pnand %p120_p6, %p114_p3 }
  0x11   :  { %124 = shalt.err (!%p121_p7)
}
  0x12   :  { %s200_s22 = smov 128   ;;  %s201_s23 = smov 8  }
  0x13   :  { %24 = dma.hbm_to_vmem [thread:$0]  %s273_s0, 512, %s19_s13, [#allocation3], %s200_s22, %s200_s22, %s201_s23  }
  0x14   :  { %s202_s26 = smov [#allocation5]   ;;  %s125_s30 = scalar_lea.hbm %s274_s1, 512 }
  0x15   :  { %s30_s27 = sshll.u32 %s202_s26, 4  ;;  %p126_p8 = scmp.ne.s32.totalorder %s274_s1, %s125_s30  ;;  %s31_s27 = int_to_ptr.vmem [resolvable:$true] %s30_s27 }
  0x16   :  { %p129_p9 = scmp.lt.u32.totalorder %s125_s30, %s274_s1 }
  0x18   :  { %p131_p10 = pnand %p129_p9, %p126_p8 }
  0x1a   :  { %134 = shalt.err (!%p131_p10)
}
  0x1b   :  { %s135_s8 = scalar_lea.vmem %s31_s27, 512  ;;  %p140_p12 = scmp.lt.s32.totalorder %s31_s27, %s31_s27 }
  0x1c   :  { %p136_p11 = scmp.ne.s32.totalorder %s31_s27, %s135_s8  ;;  %p141_p13 = scmp.lt.s32.totalorder %s135_s8, %s135_s8 }
  0x1e   :  { %p142_p0 = por %p141_p13, %p140_p12 }
  0x20   :  { %p143_p1 = pnand %p142_p0, %p136_p11 }
  0x22   :  { %146 = shalt.err (!%p143_p1)
}
  0x23   :  { %36 = dma.hbm_to_vmem [thread:$0]  %s274_s1, 512, %s31_s27, [#allocation6], %s200_s22, %s200_s22, %s201_s23  }
  0x24   :  { %191 = dma.done.wait [#allocation3], 512  }
  0x25   :  { %192 = vsyncadd [#allocation3], 4294966784 }
  0x26   :  { %193 = dma.done.wait [#allocation6], 512  }
  0x27   :  { %194 = vsyncadd [#allocation6], 4294966784  ;;  %v43_v0 = vld [vmem:[#allocation2] sm:$0xff]  ;;  %v44_v1 = vld [vmem:[#allocation2 + $0x8] sm:$0xff]  ;;  %s203_s1 = smov [#allocation7]   ;;  %s204_s11 = smov [#allocation8]  }
  0x28   :  { %v45_v2 = vld [vmem:[#allocation2 + $0x10] sm:$0xff]  ;;  %v46_v3 = vld [vmem:[#allocation2 + $0x18] sm:$0xff]  ;;  %v47_v4 = vld [vmem:[#allocation5] sm:$0xff]  ;;  %s73_s10 = sshll.u32 %s203_s1, 4  ;;  %s83_s12 = sshll.u32 %s204_s11, 4  ;;  %s74_s10 = int_to_ptr.vmem [resolvable:$true] %s73_s10  ;;  %s84_s12 = int_to_ptr.vmem [resolvable:$true] %s83_s12 }
  0x29   :  { %v48_v5 = vld [vmem:[#allocation5 + $0x8] sm:$0xff]  ;;  %v49_v6 = vld [vmem:[#allocation5 + $0x10] sm:$0xff]  ;;  %v50_v7 = vld [vmem:[#allocation5 + $0x18] sm:$0xff]  ;;  %v51_v8 = vmul.f32 %v47_v4, %v43_v0  ;;  %v59_v10 = vadd.f32 %v47_v4, %v43_v0  ;;  %s147_s13 = scalar_lea.vmem %s74_s10, 128  ;;  %p152_p3 = scmp.lt.s32.totalorder %s74_s10, %s74_s10 }
  0x2a   :  { %v52_v9 = vmul.f32 %v48_v5, %v44_v1  ;;  %v60_v11 = vadd.f32 %v48_v5, %v44_v1  ;;  %v53_v12 = vmul.f32 %v49_v6, %v45_v2  ;;  %v61_v13 = vadd.f32 %v49_v6, %v45_v2  ;;  %p148_p2 = scmp.ne.s32.totalorder %s74_s10, %s147_s13  ;;  %p153_p4 = scmp.lt.s32.totalorder %s147_s13, %s147_s13 }
  0x2b   :  { %v54_v14 = vmul.f32 %v50_v7, %v46_v3  ;;  %v62_v16 = vadd.f32 %v50_v7, %v46_v3 }
  0x2c   :  { %v55_v15 = vadd.f32 %v52_v9, %v51_v8  ;;  %v63_v17 = vadd.f32 %v60_v11, %v59_v10  ;;  %p154_p5 = por %p153_p4, %p152_p3 }
  0x2e   :  { %v56_v18 = vadd.f32 %v55_v15, %v53_v12  ;;  %v64_v19 = vadd.f32 %v63_v17, %v61_v13  ;;  %p155_p6 = pnand %p154_p5, %p148_p2 }
  0x30   :  { %v57_v20 = vadd.f32 %v56_v18, %v54_v14  ;;  %v65_v21 = vadd.f32 %v64_v19, %v62_v16 }
  0x32   :  { %58 = vst [vmem:[#allocation7] sm:$0xff] %v57_v20  ;;  %66 = vst [vmem:[#allocation8] sm:$0xff] %v65_v21 }
  0x33   :  { %158 = shalt.err (!%p155_p6)
}
  0x34   :  { %s159_s16 = scalar_lea.hbm %s275_s2, 128 }
  0x35   :  { %p160_p7 = scmp.ne.s32.totalorder %s275_s2, %s159_s16  ;;  %p163_p8 = scmp.lt.u32.totalorder %s159_s16, %s275_s2 }
  0x37   :  { %p165_p9 = pnand %p163_p8, %p160_p7 }
  0x39   :  { %168 = shalt.err (!%p165_p9)
}
  0x3a   :  { %76 = dma.vmem_to_hbm [thread:$0]  %s74_s10, 128, %s275_s2, [#allocation4]  }
  0x3b   :  { %s169_s23 = scalar_lea.vmem %s84_s12, 128  ;;  %p174_p11 = scmp.lt.s32.totalorder %s84_s12, %s84_s12 }
  0x3c   :  { %p170_p10 = scmp.ne.s32.totalorder %s84_s12, %s169_s23  ;;  %p175_p12 = scmp.lt.s32.totalorder %s169_s23, %s169_s23 }
  0x3e   :  { %p176_p13 = por %p175_p12, %p174_p11 }
  0x40   :  { %p177_p0 = pnand %p176_p13, %p170_p10 }
  0x42   :  { %180 = shalt.err (!%p177_p0)
}
  0x43   :  { %s181_s26 = scalar_lea.hbm %s276_s3, 128 }
  0x44   :  { %p182_p1 = scmp.ne.s32.totalorder %s276_s3, %s181_s26  ;;  %p185_p2 = scmp.lt.u32.totalorder %s181_s26, %s276_s3 }
  0x46   :  { %p187_p3 = pnand %p185_p2, %p182_p1 }
  0x48   :  { %190 = shalt.err (!%p187_p3)
}
  0x49   :  { %86 = dma.vmem_to_hbm [thread:$0]  %s84_s12, 128, %s276_s3, [#allocation9]  }
  0x4a   :  { %195 = dma.done.wait [#allocation4], 128  }
  0x4b   :  { %196 = vsyncadd [#allocation4], 4294967168 }
  0x4c   :  { %197 = dma.done.wait [#allocation9], 128  }
  0x4d   :  { %198 = vsyncadd [#allocation9], 4294967168 }
  0x4e   :  { %93 = vsyncpa [#allocation3], 1 }
  0x4f   :  { %94 = vsyncpa [#allocation6], 1 }
  0x50   :  { %95 = vsyncpa [#allocation4], 1 }
  0x51   :  { %96 = vsyncpa [#allocation9], 1 }

</bundles_post_ra>
